<compile_context>
chip_gen: v5e
topology: v5e:2x2
jax: 0.10.0
libtpu: 0.0.40
codegen_flags: <defaults>
</compile_context>

<pallas_src>
import functools

import jax
import jax.numpy as jnp
from jax.experimental import pallas as pl
from jax.experimental.pallas import tpu as pltpu

_NEG_BIG = -1e9  # finite "minus infinity" used when masking OOB class columns


def _round_up(x, m):
    return ((x + m - 1) // m) * m


def _emit_tile_sum(out_ref, losses, n, tm):
    """Mask OOB rows (if the row tile is ragged) and emit the tile partial sum."""
    if n % tm != 0:
        rows = (jax.lax.broadcasted_iota(jnp.int32, losses.shape, 0)
                + pl.program_id(0) * tm)
        # where (NOT multiply): losses of OOB rows may be NaN/Inf garbage.
        losses = jnp.where(rows < n, losses, 0.0)
    tile_sum = jnp.sum(losses)
    out_ref[...] = jnp.broadcast_to(tile_sum, out_ref.shape).astype(jnp.float32)


def _ce_kernel(logits_ref, tgt_ref, out_ref, *scratch, n, c, num_j):
    """Process one (tm, tc) tile of the cross-entropy reduction."""
    j = pl.program_id(1)
    tm, tc = logits_ref.shape

    # Single full-tile f32 bind.  (v5e note: if the bundle dump shows a
    # full-tile VMEM round-trip of this temporary, inline logits_ref[...] at
    # each use instead -- redundant bf16->f32 converts are cheap VPU filler.)
    x = logits_ref[...].astype(jnp.float32)                    # (tm, tc)
    cols = jax.lax.broadcasted_iota(jnp.int32, (tm, tc), 1)    # local lane ids

    if c % tc != 0:
        # Ragged class tail: OOB lanes of the last class tile hold undefined
        # data, so mask them before max/exp/pick.  Static no-op otherwise.
        x = jnp.where(cols < (c - j * tc), x, _NEG_BIG)

    # One-hot target pick against the SHIFTED target (a (tm,1) op) -- avoids
    # adding j*tc to the full (tm,tc) iota every step.
    local_tgt = tgt_ref[...] - j * tc                          # (tm, 1) int32
    pick = jnp.sum(jnp.where(cols == local_tgt, x, 0.0), axis=-1, keepdims=True)

    if num_j == 1:
        # Fast path: whole class axis in one tile -> plain logsumexp, no
        # online rescale, no scratch traffic.
        m = jnp.max(x, axis=-1, keepdims=True)
        l = jnp.sum(jnp.exp(x - m), axis=-1, keepdims=True)
        losses = (m + jnp.log(l)) - pick
        _emit_tile_sum(out_ref, losses, n, tm)
    else:
        m_sc, l_sc, p_sc = scratch

        @pl.when(j == 0)
        def _init():
            m_sc[...] = jnp.full_like(m_sc, -jnp.inf)
            l_sc[...] = jnp.zeros_like(l_sc)
            p_sc[...] = jnp.zeros_like(p_sc)

        # Online logsumexp streamed across class tiles.  m/l/p for OOB rows
        # of a ragged row tile are meaningless garbage; they are discarded by
        # the row mask at emit time -- never rely on them.
        m_prev = m_sc[...]                                     # (tm, 1)
        m_new = jnp.maximum(m_prev, jnp.max(x, axis=-1, keepdims=True))
        alpha = jnp.exp(m_prev - m_new)                        # rescale old sum
        l_sc[...] = alpha * l_sc[...] + jnp.sum(jnp.exp(x - m_new),
                                                axis=-1, keepdims=True)
        m_sc[...] = m_new
        p_sc[...] += pick

        @pl.when(j == num_j - 1)
        def _finalize():
            losses = (m_sc[...] + jnp.log(l_sc[...])) - p_sc[...]
            _emit_tile_sum(out_ref, losses, n, tm)


def cross_entropy_loss(logits, targets, *, tm=128, tc=8192):
    """Equivalent of nn.CrossEntropyLoss()(logits, targets) (mean reduction).

    logits:  (N, C) float array (f32 or bf16; bf16 halves HBM traffic -- the
             kernel upcasts per tile and does all math in f32)
    targets: (N,)   integer class indices in [0, C)
    returns: scalar float32 mean loss
    """
    # TODO(synk): nn.CrossEntropyLoss extras (ignore_index=-100, class weights,
    # label_smoothing) are not implemented; targets must be valid class indices.
    n, c = logits.shape
    itemsize = jnp.dtype(logits.dtype).itemsize

    # --- tile selection --------------------------------------------------
    # Class axis: take the whole axis when it fits one tile (any width is a
    # legal block when equal to the array dim -> enables the fast path);
    # otherwise stream multiples-of-128 tiles and mask the ragged tail.
    if c <= tc:
        tc = c
    # Row axis: multiples of 8 (or the full dim).  Keep >= 2 row tiles when N
    # allows it so the second v7x TensorCore has work on the parallel axis.
    if n <= tm:
        tm = _round_up(pl.cdiv(n, 2), 8) if n >= 16 else n

    num_i = pl.cdiv(n, tm)
    num_j = pl.cdiv(c, tc)

    tgt2d = targets.astype(jnp.int32).reshape(n, 1)            # no padding

    cost = pl.CostEstimate(
        flops=5 * n * c,
        transcendentals=n * c + n,
        bytes_accessed=n * c * itemsize + n * 4 + num_i * 8 * 128 * 4,
    )

    scratch = [] if num_j == 1 else [
        pltpu.VMEM((tm, 1), jnp.float32),   # running max
        pltpu.VMEM((tm, 1), jnp.float32),   # running sum(exp)
        pltpu.VMEM((tm, 1), jnp.float32),   # picked target logit
    ]

    partials = pl.pallas_call(
        functools.partial(_ce_kernel, n=n, c=c, num_j=num_j),
        out_shape=jax.ShapeDtypeStruct((num_i * 8, 128), jnp.float32),
        grid=(num_i, num_j),
        in_specs=[
            # logits: (tm, tc) tile streamed over the class axis (innermost).
            # If profiling shows exposed DMA at step boundaries, add
            # pipeline_mode=pl.Buffered(3) here.
            pl.BlockSpec((tm, tc), lambda i, j: (i, j)),
            # targets: one (tm, 1) block per row tile; index ignores j so the
            # block stays resident across the class loop.
            pl.BlockSpec((tm, 1), lambda i, j: (i, 0)),
        ],
        # lane-dense per-row-tile partial sums; each row tile owns its own
        # (8, 128) output block so the row axis can be megacore-parallel.
        out_specs=pl.BlockSpec((8, 128), lambda i, j: (i, 0)),
        scratch_shapes=scratch,
        compiler_params=pltpu.CompilerParams(
            dimension_semantics=("parallel", "arbitrary"),
            # 128x8192 f32 tile = 4 MiB live (8 MiB double-buffered) plus
            # elementwise intermediates: comfortably under v7x's 64 MiB.
            vmem_limit_bytes=48 * 1024 * 1024,
        ),
        cost_estimate=cost,
    )(logits, tgt2d)

    # Tiny final reduction in plain JAX: sum of per-tile partials / GLOBAL N.
    per_tile = partials.reshape(num_i, 8, 128)[:, 0, 0]
    return jnp.sum(per_tile) / jnp.float32(n)


def _reference(logits, targets):
    # pure-JAX reference for a quick self-check
    logits = logits.astype(jnp.float32)
    lse = jax.nn.logsumexp(logits, axis=-1)
    picked = jnp.take_along_axis(logits, targets[:, None], axis=-1)[:, 0]
    return jnp.mean(lse - picked)


if __name__ == "__main__":
    key = jax.random.PRNGKey(0)
    k1, k2 = jax.random.split(key)

    N, C = 8, 32          # small shapes: batch=8, num_classes=32
    # bf16 logits halve HBM traffic for this HBM-bound kernel; math stays f32.
    y_hat = jax.random.normal(k1, (N, C), dtype=jnp.float32).astype(jnp.bfloat16)
    y = jax.random.randint(k2, (N,), 0, C, dtype=jnp.int32)   # gt_dict['y']

    loss = cross_entropy_loss(y_hat, y)
    jax.block_until_ready(loss)

    ref = _reference(y_hat, y)
    assert jnp.allclose(loss, ref, atol=1e-5, rtol=1e-5), (loss, ref)

    print("KERNEL_OK")
</pallas_src>

<mosaic_0001>
module attributes {stable_mosaic.version = 11 : i64} {
  func.func @_ce_kernel(%arg0: i32, %arg1: i32, %arg2: memref<8x32xbf16, #tpu.memory_space<vmem>>, %arg3: memref<8x1xi32, #tpu.memory_space<vmem>>, %arg4: memref<8x128xf32, #tpu.memory_space<vmem>>) attributes {dimension_semantics = [#tpu.dimension_semantics<parallel>, #tpu.dimension_semantics<arbitrary>], iteration_bounds = array<i64: 1, 1>, scalar_prefetch = 0 : i64, scratch_operands = 0 : i64, tpu.core_type = #tpu.core_type<tc>, window_params = [{transform_indices = @transform_0, window_bounds = array<i64: 8, 32>}, {transform_indices = @transform_1, window_bounds = array<i64: 8, 1>}, {transform_indices = @transform_2, window_bounds = array<i64: 8, 128>}]} {
    %c0 = arith.constant 0 : index
    %c0_0 = arith.constant 0 : index
    %0 = vector.load %arg2[%c0, %c0_0] : memref<8x32xbf16, #tpu.memory_space<vmem>>, vector<8x32xbf16>
    %1 = arith.extf %0 : vector<8x32xbf16> to vector<8x32xf32>
    %2 = tpu.iota {dimensions = array<i32: 1>} : vector<8x32xi32>
    %c0_1 = arith.constant 0 : index
    %c0_2 = arith.constant 0 : index
    %3 = vector.load %arg3[%c0_1, %c0_2] : memref<8x1xi32, #tpu.memory_space<vmem>>, vector<8x1xi32>
    %c32_i32 = arith.constant 32 : i32
    %4 = arith.muli %arg1, %c32_i32 : i32
    %5 = vector.broadcast %4 : i32 to vector<8x1xi32>
    %6 = arith.subi %3, %5 : vector<8x1xi32>
    %7 = vector.broadcast %6 : vector<8x1xi32> to vector<8x32xi32>
    %8 = arith.cmpi eq, %2, %7 : vector<8x32xi32>
    %cst = arith.constant 0.000000e+00 : f32
    %9 = vector.broadcast %cst : f32 to vector<8x32xf32>
    %10 = arith.select %8, %1, %9 : vector<8x32xi1>, vector<8x32xf32>
    %cst_3 = arith.constant dense<0.000000e+00> : vector<8xf32>
    %11 = vector.multi_reduction <add>, %10, %cst_3 [1] : vector<8x32xf32> to vector<8xf32>
    %12 = vector.shape_cast %11 : vector<8xf32> to vector<8x1xf32>
    %cst_4 = arith.constant dense<0xFF800000> : vector<8xf32>
    %13 = vector.multi_reduction <maximumf>, %1, %cst_4 [1] : vector<8x32xf32> to vector<8xf32>
    %14 = vector.shape_cast %13 : vector<8xf32> to vector<8x1xf32>
    %15 = vector.broadcast %14 : vector<8x1xf32> to vector<8x32xf32>
    %16 = arith.subf %1, %15 : vector<8x32xf32>
    %17 = math.exp %16 : vector<8x32xf32>
    %cst_5 = arith.constant dense<0.000000e+00> : vector<8xf32>
    %18 = vector.multi_reduction <add>, %17, %cst_5 [1] : vector<8x32xf32> to vector<8xf32>
    %19 = vector.shape_cast %18 : vector<8xf32> to vector<8x1xf32>
    %20 = math.log %19 : vector<8x1xf32>
    %21 = arith.addf %14, %20 : vector<8x1xf32>
    %22 = arith.subf %21, %12 : vector<8x1xf32>
    %23 = vector.shape_cast %22 : vector<8x1xf32> to vector<1x8x1xf32>
    %cst_6 = arith.constant dense<0.000000e+00> : vector<1xf32>
    %24 = vector.multi_reduction <add>, %23, %cst_6 [1, 2] : vector<1x8x1xf32> to vector<1xf32>
    %25 = vector.shape_cast %24 : vector<1xf32> to vector<1x1x1xf32>
    %26 = vector.extract %25[0, 0, 0] : f32 from vector<1x1x1xf32>
    %27 = vector.broadcast %26 : f32 to vector<8x128xf32>
    %c0_7 = arith.constant 0 : index
    %c0_8 = arith.constant 0 : index
    %28 = vector.load %arg4[%c0_7, %c0_8] : memref<8x128xf32, #tpu.memory_space<vmem>>, vector<8x128xf32>
    tpu.vector_store %arg4[%c0_7, %c0_8], %27 {strides = array<i32>} : memref<8x128xf32, #tpu.memory_space<vmem>>, vector<8x128xf32>,
    return
  }
  func.func @transform_0(%arg0: i32, %arg1: i32) -> (i32, i32) {
    %c0_i32 = arith.constant 0 : i32
    return %arg0, %arg1 : i32, i32
  }
  func.func @transform_1(%arg0: i32, %arg1: i32) -> (i32, i32) {
    %c0_i32 = arith.constant 0 : i32
    %c0_i32_0 = arith.constant 0 : i32
    return %arg0, %c0_i32 : i32, i32
  }
  func.func @transform_2(%arg0: i32, %arg1: i32) -> (i32, i32) {
    %c0_i32 = arith.constant 0 : i32
    %c0_i32_0 = arith.constant 0 : i32
    return %arg0, %c0_i32 : i32, i32
  }
}

</mosaic_0001>

<bundles_post_ra>
// kernel: tpu_custom_call.1
= control target key start
LH: loop header
LB: loop body
LE: loop exit
PB: predicated region body
PF: predicated region fallthrough
CT: control target
= control target key end

     0   :  { %vm25_vm0 = vcmask 261120   ;;  %v106_v2 = vmov 0   ;;  %s135_s0 = inlined_call_operand.vmem [shape: bf16[8,32], index: 0, kind: input, shape index: {}]   ;;  %s136_s1 = inlined_call_operand.vmem [shape: s32[8,1], index: 1, kind: input, shape index: {}]   ;;  %s137_s2 = inlined_call_operand.hbm [shape: f32[8,128], index: 2, kind: output, shape index: {}]  }
   0x1   :  { %v12_v0 = vld [vmem:[%s135_s0] sm:$0xf]  ;;  %75 = vset.pattern.permute.xlu0 %v106_v2 }
   0x2   :  { %v13_v1 = vunpack.c.l.bf16 %v12_v0 }
   0x3   :  { %7 = vsyncpa [#allocation3], 0  ;;  %v16_v4 = vld [vmem:[%s136_s1] sm:$0xff]  ;;  %v14_v10 = vlaneseq  ;;  %vm42_vm2 = vcmask 7168   ;;  %s107_s0 = smov [#allocation2]   ;;  %s62_s15 = sshll.u32 %s137_s2, 4  ;;  %s63_s15 = int_to_ptr.hbm [resolvable:$true] %s62_s15 }
   0x4   :  { %v29_v3 = vsel %vm25_vm0, %v13_v1, -inf  ;;  %s60_s1 = sshll.u32 %s107_s0, 4  ;;  %s61_s1 = int_to_ptr.vmem [resolvable:$true] %s60_s1 }
   0x5   :  { %30 = vmax.xlane.f32.xlu0 %v29_v3  ;;  %v15_v11 = vand.u32 127, %v14_v10 }
  0x19   :  { %21 = vperm.xlu0 %75, %v16_v4  }
  0x78   :  { %v31_v5 = vpop.xlane.xlu0 %30 }
  0x79   :  { %v32_v6 = vsub.f32 %v13_v1, %v31_v5 }
  0x7b   :  { %v33_v7 = vmul.f32 1.442695, %v32_v6 }
  0x7d   :  { %76 = vpow2.f32 %v33_v7 }
  0x83   :  { %v77_v8 = vpop.eup %76 }
  0x84   :  { %v35_v9 = vsel %vm25_vm0, %v77_v8, 0.0 }
  0x85   :  { %36 = vadd.xlane.f32.xlu1 %v35_v9 }
  0x8b   :  { %v22_v12 = vpop.permute.xlu0 %21 }
  0x8c   :  { %vm23_vm1 = vcmp.eq.s32.totalorder %v15_v11, %v22_v12 }
  0x8d   :  { %v24_v13 = vsel %vm23_vm1, %v13_v1, 0.0 }
  0x8e   :  { %v26_v14 = vsel %vm25_vm0, %v24_v13, 0.0 }
  0x8f   :  { %27 = vadd.xlane.f32.xlu1 %v26_v14 }
  0xf8   :  { %v37_v15 = vpop.xlane.xlu1 %36 }
  0xf9   :  { %78 = vlog2.f32 %v37_v15 }
  0xff   :  { %v79_v16 = vpop.eup %78 }
 0x100   :  { %v39_v17 = vmul.f32 0.6931472, %v79_v16 }
 0x102   :  { %v40_v18 = vadd.f32 %v39_v17, %v31_v5  ;;  %v28_v19 = vpop.xlane.xlu1 %27 }
 0x104   :  { %v41_v20 = vsub.f32 %v40_v18, %v28_v19 }
 0x106   :  { %v43_v21 = vsel %vm42_vm2, %v41_v20, 0.0 }
 0x107   :  { %44 = vadd.xlane.f32.xlu2 %v43_v21 }
 0x17a   :  { %v45_v22 = vpop.xlane.xlu2 %44 }
 0x17b   :  { %v46_v23 = vrot.slane %v45_v22, 4 }
 0x17d   :  { %v47_v24 = vadd.f32 %v46_v23, %v45_v22 }
 0x17f   :  { %v48_v25 = vrot.slane %v47_v24, 2 }
 0x181   :  { %v49_v26 = vadd.f32 %v48_v25, %v47_v24 }
 0x183   :  { %v50_v27 = vrot.slane %v49_v26, 1 }
 0x185   :  { %v51_v28 = vadd.f32 %v50_v27, %v49_v26 }
 0x187   :  { %71 = vpush %v51_v28 }
 0x1b8   :  { %s72_s16 = spop %71 }
 0x1b9   :  { %v53_v29 = vstv %s72_s16 }
 0x1ba   :  { %54 = vst [vmem:[#allocation2] sm:$0xff] %v53_v29 }
 0x1bb   :  { %65 = dma.vmem_to_hbm [thread:$0]  %s61_s1, 128, %s63_s15, [#allocation3]  }
 0x1bc   :  { %104 = dma.done.wait [#allocation3], 128  }
 0x1bd   :  { %105 = vsyncadd [#allocation3], 4294967168 }
 0x1be   :  { %70 = vsyncpa [#allocation3], 1 }

</bundles_post_ra>
